<compile_context>
chip_gen: v7x
topology: tpu7x:2x2x1
jax: 0.10.0
libtpu: 0.0.40
codegen_flags: <defaults>
</compile_context>

<pallas_src>
import jax
import jax.numpy as jnp
from jax import lax
from jax.experimental import pallas as pl
from jax.experimental.pallas import tpu as pltpu

S, B, D = 8, 2, 32            # seq_len, batch, model_dimension
H = 4                          # heads
DK = D // H                    # d_k
P = 64                         # projection_dimension (FFN hidden)
SB = S * B                     # 16 activation rows per instance (row r = t*B + b)
EPS = 1e-5
SCALE = 1.0 / (DK ** 0.5)
SCALE2 = SCALE * SCALE         # reference applies SCALE twice (hs and scores)
NEG = -1e30                    # cross-batch mask value -> softmax weight exactly 0

# ---------------- packed weight/constant slab layout (NROW, NCOL) ----------------
NCOL = 4 * D + P               # 192 lanes
ROW_WCAT = 0                   # rows   0.. 31 : [wq | wv | wr | wo | wf1]   (D, 192)
ROW_WF2 = ROW_WCAT + D         # rows  32.. 95 : wf2                         (P, D)
ROW_MASK = ROW_WF2 + P         # rows  96..159 : additive softmax mask       (H*SB, SB)
ROW_HM = ROW_MASK + H * SB     # rows 160..163 : per-head lane masks         (H, D)
ROW_VEC = ROW_HM + 8           # rows 168..177 : stacked (1, D) vectors      (10, D)
ROW_BF1 = ROW_VEC + 16         # row  184      : bf1                         (1, P)
NROW = ROW_BF1 + 8             # 192 rows total

# vec row offsets within ROW_VEC
(V_BQ, V_BV, V_BR, V_BO, V_WEFF, V_G1, V_BE1, V_BF2, V_G2, V_BE2) = range(10)
# wcat column offsets
C_WO, C_WF1 = 3 * D, 4 * D


def transformer_block_kernel(data_ref, w_ref, o_ref):
    # data_ref: (SB+B, D) = [x rows | h0 rows] for one instance
    # w_ref   : (NROW, NCOL) packed weights/constants (shared, DMA'd once)
    # o_ref   : (SB, D)
    x = data_ref[0:SB, :]                              # (16, 32)
    h0 = data_ref[SB:SB + B, :]                        # (2, 32)

    def vrow(row, n, width=D):
        # one packed (1, width) row, broadcast once (hoisted, not per-use).
        # TODO(synk): a stride-0 sublane-broadcast load (pl.ds(row, n, stride=0))
        # would avoid even this single broadcast op.
        return jnp.broadcast_to(w_ref[row:row + 1, 0:width], (n, width))

    # --- fused q/v/r projection: one MXU matmul, slice the result in-register ---
    qvr = jnp.dot(x, w_ref[0:D, 0:3 * D],
                  preferred_element_type=jnp.float32)              # (16, 96)
    q = (qvr[:, 0:D] + vrow(ROW_VEC + V_BQ, SB)) * SCALE2          # both scales folded
    v = qvr[:, D:2 * D] + vrow(ROW_VEC + V_BV, SB)
    rp = qvr[:, 2 * D:3 * D] + vrow(ROW_VEC + V_BR, SB)

    # --- recurrence: h_t = tanh(h_{t-1} * rowsum(W_h) + R_t), both batches at once ---
    w_eff = vrow(ROW_VEC + V_WEFF, B)                  # (2, 32)
    h = h0
    hs_rows = []
    for t in range(S):                                 # static unroll, stays in vregs
        h = jnp.tanh(h * w_eff + rp[t * B:(t + 1) * B, :])
        hs_rows.append(h)
    hs = jnp.concatenate(hs_rows, axis=0)              # (16, 32)

    # --- block-diagonal multi-head attention: 2 MXU calls for all 4 heads ---
    hm = [vrow(ROW_HM + hh, SB) for hh in range(H)]    # per-head lane masks (16, 32)
    q_big = jnp.concatenate([q * hm[hh] for hh in range(H)], axis=0)   # (64, 32)
    # contract dim 1 of both operands -> no explicit hs.T materialization
    scores = lax.dot_general(q_big, hs, (((1,), (1,)), ((), ())),
                             preferred_element_type=jnp.float32)       # (64, 16)
    scores = scores + w_ref[ROW_MASK:ROW_MASK + H * SB, 0:SB]          # packed mask
    # one fused softmax over the lane axis for all heads / rows
    m = jnp.max(scores, axis=-1, keepdims=True)
    e = jnp.exp(scores - m)
    w = e / jnp.sum(e, axis=-1, keepdims=True)         # exact division (1e-4 check)
    t_all = jnp.dot(w, v, preferred_element_type=jnp.float32)          # (64, 32)
    attn = (t_all[0 * SB:1 * SB, :] * hm[0] + t_all[1 * SB:2 * SB, :] * hm[1]
            + t_all[2 * SB:3 * SB, :] * hm[2] + t_all[3 * SB:4 * SB, :] * hm[3])
    attn = jnp.dot(attn, w_ref[0:D, C_WO:C_WO + D],
                   preferred_element_type=jnp.float32) + vrow(ROW_VEC + V_BO, SB)

    # --- residual + LayerNorm 1 ---
    y = x + attn
    mu = jnp.mean(y, axis=-1, keepdims=True)
    var = jnp.mean((y - mu) ** 2, axis=-1, keepdims=True)
    y = (y - mu) * lax.rsqrt(var + EPS) * vrow(ROW_VEC + V_G1, SB) \
        + vrow(ROW_VEC + V_BE1, SB)

    # --- feed-forward: Linear -> ReLU -> Linear ---
    f = jnp.dot(y, w_ref[0:D, C_WF1:C_WF1 + P],
                preferred_element_type=jnp.float32) + vrow(ROW_BF1, SB, P)
    f = jnp.maximum(f, 0.0)
    f = jnp.dot(f, w_ref[ROW_WF2:ROW_WF2 + P, 0:D],
                preferred_element_type=jnp.float32) + vrow(ROW_VEC + V_BF2, SB)

    # --- residual + LayerNorm 2 ---
    z = y + f
    mu2 = jnp.mean(z, axis=-1, keepdims=True)
    var2 = jnp.mean((z - mu2) ** 2, axis=-1, keepdims=True)
    o_ref[...] = ((z - mu2) * lax.rsqrt(var2 + EPS) * vrow(ROW_VEC + V_G2, SB)
                  + vrow(ROW_VEC + V_BE2, SB)).astype(o_ref.dtype)


# ---------------- host-side packing ----------------
def pack_weight_slab(params):
    (wq, bq, wv, bv, wr, br, w_h, wo, bo, g1, be1,
     wf1, bf1, wf2, bf2, g2, be2) = params
    slab = jnp.zeros((NROW, NCOL), jnp.float32)
    # fused weights
    wcat = jnp.concatenate([wq, wv, wr, wo, wf1], axis=1)          # (32, 192)
    slab = slab.at[ROW_WCAT:ROW_WCAT + D, :].set(wcat)
    slab = slab.at[ROW_WF2:ROW_WF2 + P, 0:D].set(wf2)
    # additive softmax mask for flattened rows r = t*B + b, tiled over the H
    # sublane blocks of the head-stacked score matrix.
    r = jnp.arange(SB)
    tq, bqi = r // B, r % B
    same_batch = bqi[:, None] == bqi[None, :]
    causal_quirk = (tq[None, :] > tq[:, None]).astype(jnp.float32)  # bool added as +1.0
    m16 = jnp.where(same_batch, causal_quirk, jnp.float32(NEG))     # (16, 16)
    slab = slab.at[ROW_MASK:ROW_MASK + H * SB, 0:SB].set(jnp.tile(m16, (H, 1)))
    # per-head lane masks (1.0 in lanes [h*DK, (h+1)*DK))
    lane = jnp.arange(D)
    hmask = ((lane[None, :] // DK) == jnp.arange(H)[:, None]).astype(jnp.float32)
    slab = slab.at[ROW_HM:ROW_HM + H, 0:D].set(hmask)
    # row vectors; einsum('hnk,bhn->bhn', W_h, h) == h * W_h.sum(-1)
    weff = jnp.sum(w_h, axis=-1).reshape(1, D)
    vecs = jnp.concatenate([bq, bv, br, bo, weff, g1, be1, bf2, g2, be2], axis=0)
    slab = slab.at[ROW_VEC:ROW_VEC + 10, 0:D].set(vecs)
    slab = slab.at[ROW_BF1:ROW_BF1 + 1, 0:P].set(bf1)
    return slab


def transformer_block(x_all, h0_all, slab):
    """x_all: (G, S, B, D) seq-major like the PyTorch module; h0_all: (G, B, D)."""
    G = x_all.shape[0]
    # per-instance data slab: x rows then h0 rows -> one DMA per grid step
    data = jnp.concatenate([x_all.reshape(G, SB, D), h0_all], axis=1)   # (G, SB+B, D)
    out = pl.pallas_call(
        transformer_block_kernel,
        out_shape=jax.ShapeDtypeStruct((G, SB, D), jnp.float32),
        grid=(G,),
        in_specs=[
            pl.BlockSpec((None, SB + B, D), lambda g: (g, 0, 0)),   # per-instance data
            pl.BlockSpec((NROW, NCOL), lambda g: (0, 0)),           # shared weight slab
        ],
        out_specs=pl.BlockSpec((None, SB, D), lambda g: (g, 0, 0)),
        compiler_params=pltpu.CompilerParams(dimension_semantics=("parallel",)),
    )(data, slab)
    return out.reshape(G, S, B, D)


# ---------------- deterministic parameter init ----------------
def _xavier(key, shape):
    fan_in, fan_out = shape[-2], shape[-1]
    lim = (6.0 / (fan_in + fan_out)) ** 0.5
    return jax.random.uniform(key, shape, jnp.float32, -lim, lim)


def init_params(key):
    ks = jax.random.split(key, 10)
    wq = _xavier(ks[0], (D, D)); bq = jnp.zeros((1, D), jnp.float32)
    wv = _xavier(ks[1], (D, D)); bv = jnp.zeros((1, D), jnp.float32)
    wr = _xavier(ks[2], (D, D)); br = jnp.zeros((1, D), jnp.float32)
    w_h = _xavier(ks[3], (H, DK, DK))
    wo = _xavier(ks[4], (D, D))
    bo = jax.random.uniform(ks[5], (1, D), jnp.float32, -0.1, 0.1)
    g1 = jnp.ones((1, D), jnp.float32); be1 = jnp.zeros((1, D), jnp.float32)
    wf1 = _xavier(ks[6], (D, P))
    bf1 = jax.random.uniform(ks[7], (1, P), jnp.float32, -0.1, 0.1)
    wf2 = _xavier(ks[8], (P, D))
    bf2 = jax.random.uniform(ks[9], (1, D), jnp.float32, -0.1, 0.1)
    g2 = jnp.ones((1, D), jnp.float32); be2 = jnp.zeros((1, D), jnp.float32)
    return (wq, bq, wv, bv, wr, br, w_h, wo, bo, g1, be1,
            wf1, bf1, wf2, bf2, g2, be2)


# ---------------- pure-JAX reference (for validation) ----------------
def _layernorm(x, g, b):
    mu = jnp.mean(x, axis=-1, keepdims=True)
    var = jnp.mean((x - mu) ** 2, axis=-1, keepdims=True)
    return (x - mu) * lax.rsqrt(var + EPS) * g + b


def reference(x_sbd, h0, params):
    (wq, bq, wv, bv, wr, br, w_h, wo, bo, g1, be1,
     wf1, bf1, wf2, bf2, g2, be2) = params
    x = jnp.transpose(x_sbd, (1, 0, 2))                  # (B, S, D) like xt in PyTorch
    mask = jnp.triu(jnp.ones((S, S), jnp.float32), k=1)  # bool mask added as +1.0

    q = x @ wq + bq
    v = x @ wv + bv
    rp = x @ wr + br
    weff = jnp.sum(w_h, axis=-1).reshape(D)              # einsum('hnk,bhn->bhn') quirk

    def scan_body(h, r_t):
        h_new = jnp.tanh(h * weff + r_t)
        return h_new, h_new

    _, hs = lax.scan(scan_body, h0, jnp.transpose(rp, (1, 0, 2)))
    hs = jnp.transpose(hs, (1, 0, 2)) * SCALE            # (B, S, D)

    def heads(a):
        return a.reshape(B, S, H, DK).transpose(0, 2, 1, 3)

    qh, vh, hsh = heads(q), heads(v), heads(hs)
    scores = jnp.einsum('bhqd,bhkd->bhqk', qh, hsh) * SCALE + mask
    w = jax.nn.softmax(scores, axis=-1)
    ao = jnp.einsum('bhqk,bhkd->bhqd', w, vh).transpose(0, 2, 1, 3).reshape(B, S, D)
    ao = ao @ wo + bo

    y = _layernorm(x + ao, g1, be1)
    f = jnp.maximum(y @ wf1 + bf1, 0.0) @ wf2 + bf2
    z = _layernorm(y + f, g2, be2)
    return jnp.transpose(z, (1, 0, 2))


if __name__ == "__main__":
    G = 8                                      # independent TransformerBlock instances
    key = jax.random.PRNGKey(0)
    k_x, k_h, k_p = jax.random.split(key, 3)
    # Input layout matches the PyTorch TransformerBlock: (seq, batch, d_model)
    x_all = jax.random.normal(k_x, (G, S, B, D), jnp.float32)
    # TODO(synk): dropout layers and the per-call random h0 have no in-kernel
    # equivalent; dropouts are identity (eval mode) and h0 is a deterministic input
    # (stand-in for torch.randn(B, H, d_k) * 0.01, head-major flatten).
    h0_all = (jax.random.normal(k_h, (G, B, H, DK), jnp.float32) * 0.01).reshape(G, B, D)
    params = init_params(k_p)

    slab = pack_weight_slab(params)            # done once, not per call

    out = transformer_block(x_all, h0_all, slab)
    out = jax.block_until_ready(out)

    ref = jax.vmap(lambda xg, hg: reference(xg, hg, params))(x_all, h0_all)
    assert out.shape == (G, S, B, D)
    max_err = float(jnp.max(jnp.abs(out - ref)))
    assert jnp.allclose(out, ref, atol=1e-4, rtol=1e-4), f"max_err={max_err}"
    print("KERNEL_OK")
</pallas_src>

<mosaic_0001>
module attributes {stable_mosaic.version = 11 : i64} {
  func.func @transformer_block_kernel(%arg0: i32, %arg1: memref<1x18x32xf32, #tpu.memory_space<vmem>>, %arg2: memref<192x192xf32, #tpu.memory_space<vmem>>, %arg3: memref<1x16x32xf32, #tpu.memory_space<vmem>>) attributes {dimension_semantics = [#tpu.dimension_semantics<parallel>], iteration_bounds = array<i64: 8>, scalar_prefetch = 0 : i64, scratch_operands = 0 : i64, tpu.core_type = #tpu.core_type<tc>, window_params = [{transform_indices = @transform_0, window_bounds = array<i64: 1, 18, 32>}, {pipeline_mode = #tpu.pipeline_mode<synchronous>, transform_indices = @transform_1, window_bounds = array<i64: 192, 192>}, {transform_indices = @transform_2, window_bounds = array<i64: 1, 16, 32>}]} {
    %c0 = arith.constant 0 : index
    %c0_0 = arith.constant 0 : index
    %c0_1 = arith.constant 0 : index
    %0 = vector.load %arg1[%c0, %c0_0, %c0_1] : memref<1x18x32xf32, #tpu.memory_space<vmem>>, vector<1x16x32xf32>
    %1 = vector.shape_cast %0 : vector<1x16x32xf32> to vector<16x32xf32>
    %c0_2 = arith.constant 0 : index
    %c16 = arith.constant 16 : index
    %c0_3 = arith.constant 0 : index
    %2 = vector.load %arg1[%c0_2, %c16, %c0_3] : memref<1x18x32xf32, #tpu.memory_space<vmem>>, vector<1x2x32xf32>
    %3 = vector.shape_cast %2 : vector<1x2x32xf32> to vector<2x32xf32>
    %c0_4 = arith.constant 0 : index
    %c0_5 = arith.constant 0 : index
    %4 = vector.load %arg2[%c0_4, %c0_5] : memref<192x192xf32, #tpu.memory_space<vmem>>, vector<32x96xf32>
    %cst = arith.constant dense<0.000000e+00> : vector<16x96xf32>
    %5 = tpu.matmul %1, %4, %cst {dimension_numbers = #tpu.dot_dimension_numbers<[1], [0], [0], [1], [0, 0, 1, 1], [], []>} : vector<16x32xf32>, vector<32x96xf32>, vector<16x96xf32> -> vector<16x96xf32>
    %6 = vector.extract_strided_slice %5 {offsets = [0, 0], sizes = [16, 32], strides = [1, 1]} : vector<16x96xf32> to vector<16x32xf32>
    %c168 = arith.constant 168 : index
    %c0_6 = arith.constant 0 : index
    %7 = vector.load %arg2[%c168, %c0_6] : memref<192x192xf32, #tpu.memory_space<vmem>>, vector<1x32xf32>
    %8 = vector.shape_cast %7 : vector<1x32xf32> to vector<1x32xf32>
    %9 = vector.broadcast %8 : vector<1x32xf32> to vector<16x32xf32>
    %10 = arith.addf %6, %9 : vector<16x32xf32>
    %cst_7 = arith.constant 1.250000e-01 : f32
    %11 = vector.broadcast %cst_7 : f32 to vector<16x32xf32>
    %12 = arith.mulf %10, %11 : vector<16x32xf32>
    %13 = vector.extract_strided_slice %5 {offsets = [0, 32], sizes = [16, 32], strides = [1, 1]} : vector<16x96xf32> to vector<16x32xf32>
    %c169 = arith.constant 169 : index
    %c0_8 = arith.constant 0 : index
    %14 = vector.load %arg2[%c169, %c0_8] : memref<192x192xf32, #tpu.memory_space<vmem>>, vector<1x32xf32>
    %15 = vector.shape_cast %14 : vector<1x32xf32> to vector<1x32xf32>
    %16 = vector.broadcast %15 : vector<1x32xf32> to vector<16x32xf32>
    %17 = arith.addf %13, %16 : vector<16x32xf32>
    %18 = vector.extract_strided_slice %5 {offsets = [0, 64], sizes = [16, 32], strides = [1, 1]} : vector<16x96xf32> to vector<16x32xf32>
    %c170 = arith.constant 170 : index
    %c0_9 = arith.constant 0 : index
    %19 = vector.load %arg2[%c170, %c0_9] : memref<192x192xf32, #tpu.memory_space<vmem>>, vector<1x32xf32>
    %20 = vector.shape_cast %19 : vector<1x32xf32> to vector<1x32xf32>
    %21 = vector.broadcast %20 : vector<1x32xf32> to vector<16x32xf32>
    %22 = arith.addf %18, %21 : vector<16x32xf32>
    %c172 = arith.constant 172 : index
    %c0_10 = arith.constant 0 : index
    %23 = vector.load %arg2[%c172, %c0_10] : memref<192x192xf32, #tpu.memory_space<vmem>>, vector<1x32xf32>
    %24 = vector.shape_cast %23 : vector<1x32xf32> to vector<1x32xf32>
    %25 = vector.broadcast %24 : vector<1x32xf32> to vector<2x32xf32>
    %26 = arith.mulf %3, %25 : vector<2x32xf32>
    %27 = vector.extract_strided_slice %22 {offsets = [0, 0], sizes = [2, 32], strides = [1, 1]} : vector<16x32xf32> to vector<2x32xf32>
    %28 = arith.addf %26, %27 : vector<2x32xf32>
    %29 = math.tanh %28 : vector<2x32xf32>
    %30 = arith.mulf %29, %25 : vector<2x32xf32>
    %31 = vector.extract_strided_slice %22 {offsets = [2, 0], sizes = [2, 32], strides = [1, 1]} : vector<16x32xf32> to vector<2x32xf32>
    %32 = arith.addf %30, %31 : vector<2x32xf32>
    %33 = math.tanh %32 : vector<2x32xf32>
    %34 = arith.mulf %33, %25 : vector<2x32xf32>
    %35 = vector.extract_strided_slice %22 {offsets = [4, 0], sizes = [2, 32], strides = [1, 1]} : vector<16x32xf32> to vector<2x32xf32>
    %36 = arith.addf %34, %35 : vector<2x32xf32>
    %37 = math.tanh %36 : vector<2x32xf32>
    %38 = arith.mulf %37, %25 : vector<2x32xf32>
    %39 = vector.extract_strided_slice %22 {offsets = [6, 0], sizes = [2, 32], strides = [1, 1]} : vector<16x32xf32> to vector<2x32xf32>
    %40 = arith.addf %38, %39 : vector<2x32xf32>
    %41 = math.tanh %40 : vector<2x32xf32>
    %42 = arith.mulf %41, %25 : vector<2x32xf32>
    %43 = vector.extract_strided_slice %22 {offsets = [8, 0], sizes = [2, 32], strides = [1, 1]} : vector<16x32xf32> to vector<2x32xf32>
    %44 = arith.addf %42, %43 : vector<2x32xf32>
    %45 = math.tanh %44 : vector<2x32xf32>
    %46 = arith.mulf %45, %25 : vector<2x32xf32>
    %47 = vector.extract_strided_slice %22 {offsets = [10, 0], sizes = [2, 32], strides = [1, 1]} : vector<16x32xf32> to vector<2x32xf32>
    %48 = arith.addf %46, %47 : vector<2x32xf32>
    %49 = math.tanh %48 : vector<2x32xf32>
    %50 = arith.mulf %49, %25 : vector<2x32xf32>
    %51 = vector.extract_strided_slice %22 {offsets = [12, 0], sizes = [2, 32], strides = [1, 1]} : vector<16x32xf32> to vector<2x32xf32>
    %52 = arith.addf %50, %51 : vector<2x32xf32>
    %53 = math.tanh %52 : vector<2x32xf32>
    %54 = arith.mulf %53, %25 : vector<2x32xf32>
    %55 = vector.extract_strided_slice %22 {offsets = [14, 0], sizes = [2, 32], strides = [1, 1]} : vector<16x32xf32> to vector<2x32xf32>
    %56 = arith.addf %54, %55 : vector<2x32xf32>
    %57 = math.tanh %56 : vector<2x32xf32>
    %58 = tpu.concatenate %29, %33, %37, %41, %45, %49, %53, %57 in 0 : vector<2x32xf32>, vector<2x32xf32>, vector<2x32xf32>, vector<2x32xf32>, vector<2x32xf32>, vector<2x32xf32>, vector<2x32xf32>, vector<2x32xf32> -> vector<16x32xf32>
    %c160 = arith.constant 160 : index
    %c0_11 = arith.constant 0 : index
    %59 = vector.load %arg2[%c160, %c0_11] : memref<192x192xf32, #tpu.memory_space<vmem>>, vector<1x32xf32>
    %60 = vector.shape_cast %59 : vector<1x32xf32> to vector<1x32xf32>
    %61 = vector.broadcast %60 : vector<1x32xf32> to vector<16x32xf32>
    %c161 = arith.constant 161 : index
    %c0_12 = arith.constant 0 : index
    %62 = vector.load %arg2[%c161, %c0_12] : memref<192x192xf32, #tpu.memory_space<vmem>>, vector<1x32xf32>
    %63 = vector.shape_cast %62 : vector<1x32xf32> to vector<1x32xf32>
    %64 = vector.broadcast %63 : vector<1x32xf32> to vector<16x32xf32>
    %c162 = arith.constant 162 : index
    %c0_13 = arith.constant 0 : index
    %65 = vector.load %arg2[%c162, %c0_13] : memref<192x192xf32, #tpu.memory_space<vmem>>, vector<1x32xf32>
    %66 = vector.shape_cast %65 : vector<1x32xf32> to vector<1x32xf32>
    %67 = vector.broadcast %66 : vector<1x32xf32> to vector<16x32xf32>
    %c163 = arith.constant 163 : index
    %c0_14 = arith.constant 0 : index
    %68 = vector.load %arg2[%c163, %c0_14] : memref<192x192xf32, #tpu.memory_space<vmem>>, vector<1x32xf32>
    %69 = vector.shape_cast %68 : vector<1x32xf32> to vector<1x32xf32>
    %70 = vector.broadcast %69 : vector<1x32xf32> to vector<16x32xf32>
    %71 = arith.mulf %12, %61 : vector<16x32xf32>
    %72 = arith.mulf %12, %64 : vector<16x32xf32>
    %73 = arith.mulf %12, %67 : vector<16x32xf32>
    %74 = arith.mulf %12, %70 : vector<16x32xf32>
    %75 = tpu.concatenate %71, %72, %73, %74 in 0 : vector<16x32xf32>, vector<16x32xf32>, vector<16x32xf32>, vector<16x32xf32> -> vector<64x32xf32>
    %cst_15 = arith.constant dense<0.000000e+00> : vector<64x16xf32>
    %76 = tpu.matmul %75, %58, %cst_15 {dimension_numbers = #tpu.dot_dimension_numbers<[1], [1], [0], [0], [0, 0, 1, 0], [], []>} : vector<64x32xf32>, vector<16x32xf32>, vector<64x16xf32> -> vector<64x16xf32>
    %c96 = arith.constant 96 : index
    %c0_16 = arith.constant 0 : index
    %77 = vector.load %arg2[%c96, %c0_16] : memref<192x192xf32, #tpu.memory_space<vmem>>, vector<64x16xf32>
    %78 = arith.addf %76, %77 : vector<64x16xf32>
    %cst_17 = arith.constant dense<0xFF800000> : vector<64xf32>
    %79 = vector.multi_reduction <maximumf>, %78, %cst_17 [1] : vector<64x16xf32> to vector<64xf32>
    %80 = vector.shape_cast %79 : vector<64xf32> to vector<64x1xf32>
    %81 = vector.broadcast %80 : vector<64x1xf32> to vector<64x16xf32>
    %82 = arith.subf %78, %81 : vector<64x16xf32>
    %83 = math.exp %82 : vector<64x16xf32>
    %cst_18 = arith.constant dense<0.000000e+00> : vector<64xf32>
    %84 = vector.multi_reduction <add>, %83, %cst_18 [1] : vector<64x16xf32> to vector<64xf32>
    %85 = vector.shape_cast %84 : vector<64xf32> to vector<64x1xf32>
    %86 = vector.broadcast %85 : vector<64x1xf32> to vector<64x16xf32>
    %87 = arith.divf %83, %86 : vector<64x16xf32>
    %cst_19 = arith.constant dense<0.000000e+00> : vector<64x32xf32>
    %88 = tpu.matmul %87, %17, %cst_19 {dimension_numbers = #tpu.dot_dimension_numbers<[1], [0], [0], [1], [0, 0, 1, 1], [], []>} : vector<64x16xf32>, vector<16x32xf32>, vector<64x32xf32> -> vector<64x32xf32>
    %89 = vector.extract_strided_slice %88 {offsets = [0, 0], sizes = [16, 32], strides = [1, 1]} : vector<64x32xf32> to vector<16x32xf32>
    %90 = arith.mulf %89, %61 : vector<16x32xf32>
    %91 = vector.extract_strided_slice %88 {offsets = [16, 0], sizes = [16, 32], strides = [1, 1]} : vector<64x32xf32> to vector<16x32xf32>
    %92 = arith.mulf %91, %64 : vector<16x32xf32>
    %93 = arith.addf %90, %92 : vector<16x32xf32>
    %94 = vector.extract_strided_slice %88 {offsets = [32, 0], sizes = [16, 32], strides = [1, 1]} : vector<64x32xf32> to vector<16x32xf32>
    %95 = arith.mulf %94, %67 : vector<16x32xf32>
    %96 = arith.addf %93, %95 : vector<16x32xf32>
    %97 = vector.extract_strided_slice %88 {offsets = [48, 0], sizes = [16, 32], strides = [1, 1]} : vector<64x32xf32> to vector<16x32xf32>
    %98 = arith.mulf %97, %70 : vector<16x32xf32>
    %99 = arith.addf %96, %98 : vector<16x32xf32>
    %c0_20 = arith.constant 0 : index
    %c96_21 = arith.constant 96 : index
    %100 = vector.load %arg2[%c0_20, %c96_21] : memref<192x192xf32, #tpu.memory_space<vmem>>, vector<32x32xf32>
    %cst_22 = arith.constant dense<0.000000e+00> : vector<16x32xf32>
    %101 = tpu.matmul %99, %100, %cst_22 {dimension_numbers = #tpu.dot_dimension_numbers<[1], [0], [0], [1], [0, 0, 1, 1], [], []>} : vector<16x32xf32>, vector<32x32xf32>, vector<16x32xf32> -> vector<16x32xf32>
    %c171 = arith.constant 171 : index
    %c0_23 = arith.constant 0 : index
    %102 = vector.load %arg2[%c171, %c0_23] : memref<192x192xf32, #tpu.memory_space<vmem>>, vector<1x32xf32>
    %103 = vector.shape_cast %102 : vector<1x32xf32> to vector<1x32xf32>
    %104 = vector.broadcast %103 : vector<1x32xf32> to vector<16x32xf32>
    %105 = arith.addf %101, %104 : vector<16x32xf32>
    %106 = arith.addf %1, %105 : vector<16x32xf32>
    %cst_24 = arith.constant dense<0.000000e+00> : vector<16xf32>
    %107 = vector.multi_reduction <add>, %106, %cst_24 [1] : vector<16x32xf32> to vector<16xf32>
    %108 = vector.shape_cast %107 : vector<16xf32> to vector<16x1xf32>
    %cst_25 = arith.constant 3.200000e+01 : f32
    %109 = vector.broadcast %cst_25 : f32 to vector<16x1xf32>
    %110 = arith.divf %108, %109 : vector<16x1xf32>
    %111 = vector.broadcast %110 : vector<16x1xf32> to vector<16x32xf32>
    %112 = arith.subf %106, %111 : vector<16x32xf32>
    %113 = arith.mulf %112, %112 : vector<16x32xf32>
    %cst_26 = arith.constant dense<0.000000e+00> : vector<16xf32>
    %114 = vector.multi_reduction <add>, %113, %cst_26 [1] : vector<16x32xf32> to vector<16xf32>
    %115 = vector.shape_cast %114 : vector<16xf32> to vector<16x1xf32>
    %cst_27 = arith.constant 3.200000e+01 : f32
    %116 = vector.broadcast %cst_27 : f32 to vector<16x1xf32>
    %117 = arith.divf %115, %116 : vector<16x1xf32>
    %118 = vector.broadcast %110 : vector<16x1xf32> to vector<16x32xf32>
    %119 = arith.subf %106, %118 : vector<16x32xf32>
    %cst_28 = arith.constant 9.99999974E-6 : f32
    %120 = vector.broadcast %cst_28 : f32 to vector<16x1xf32>
    %121 = arith.addf %117, %120 : vector<16x1xf32>
    %122 = math.rsqrt %121 : vector<16x1xf32>
    %123 = vector.broadcast %122 : vector<16x1xf32> to vector<16x32xf32>
    %124 = arith.mulf %119, %123 : vector<16x32xf32>
    %c173 = arith.constant 173 : index
    %c0_29 = arith.constant 0 : index
    %125 = vector.load %arg2[%c173, %c0_29] : memref<192x192xf32, #tpu.memory_space<vmem>>, vector<1x32xf32>
    %126 = vector.shape_cast %125 : vector<1x32xf32> to vector<1x32xf32>
    %127 = vector.broadcast %126 : vector<1x32xf32> to vector<16x32xf32>
    %128 = arith.mulf %124, %127 : vector<16x32xf32>
    %c174 = arith.constant 174 : index
    %c0_30 = arith.constant 0 : index
    %129 = vector.load %arg2[%c174, %c0_30] : memref<192x192xf32, #tpu.memory_space<vmem>>, vector<1x32xf32>
    %130 = vector.shape_cast %129 : vector<1x32xf32> to vector<1x32xf32>
    %131 = vector.broadcast %130 : vector<1x32xf32> to vector<16x32xf32>
    %132 = arith.addf %128, %131 : vector<16x32xf32>
    %c0_31 = arith.constant 0 : index
    %c128 = arith.constant 128 : index
    %133 = vector.load %arg2[%c0_31, %c128] : memref<192x192xf32, #tpu.memory_space<vmem>>, vector<32x64xf32>
    %cst_32 = arith.constant dense<0.000000e+00> : vector<16x64xf32>
    %134 = tpu.matmul %132, %133, %cst_32 {dimension_numbers = #tpu.dot_dimension_numbers<[1], [0], [0], [1], [0, 0, 1, 1], [], []>} : vector<16x32xf32>, vector<32x64xf32>, vector<16x64xf32> -> vector<16x64xf32>
    %c184 = arith.constant 184 : index
    %c0_33 = arith.constant 0 : index
    %135 = vector.load %arg2[%c184, %c0_33] : memref<192x192xf32, #tpu.memory_space<vmem>>, vector<1x64xf32>
    %136 = vector.shape_cast %135 : vector<1x64xf32> to vector<1x64xf32>
    %137 = vector.broadcast %136 : vector<1x64xf32> to vector<16x64xf32>
    %138 = arith.addf %134, %137 : vector<16x64xf32>
    %cst_34 = arith.constant 0.000000e+00 : f32
    %139 = vector.broadcast %cst_34 : f32 to vector<16x64xf32>
    %140 = arith.maximumf %138, %139 : vector<16x64xf32>
    %c32 = arith.constant 32 : index
    %c0_35 = arith.constant 0 : index
    %141 = vector.load %arg2[%c32, %c0_35] : memref<192x192xf32, #tpu.memory_space<vmem>>, vector<64x32xf32>
    %cst_36 = arith.constant dense<0.000000e+00> : vector<16x32xf32>
    %142 = tpu.matmul %140, %141, %cst_36 {dimension_numbers = #tpu.dot_dimension_numbers<[1], [0], [0], [1], [0, 0, 1, 1], [], []>} : vector<16x64xf32>, vector<64x32xf32>, vector<16x32xf32> -> vector<16x32xf32>
    %c175 = arith.constant 175 : index
    %c0_37 = arith.constant 0 : index
    %143 = vector.load %arg2[%c175, %c0_37] : memref<192x192xf32, #tpu.memory_space<vmem>>, vector<1x32xf32>
    %144 = vector.shape_cast %143 : vector<1x32xf32> to vector<1x32xf32>
    %145 = vector.broadcast %144 : vector<1x32xf32> to vector<16x32xf32>
    %146 = arith.addf %142, %145 : vector<16x32xf32>
    %147 = arith.addf %132, %146 : vector<16x32xf32>
    %cst_38 = arith.constant dense<0.000000e+00> : vector<16xf32>
    %148 = vector.multi_reduction <add>, %147, %cst_38 [1] : vector<16x32xf32> to vector<16xf32>
    %149 = vector.shape_cast %148 : vector<16xf32> to vector<16x1xf32>
    %cst_39 = arith.constant 3.200000e+01 : f32
    %150 = vector.broadcast %cst_39 : f32 to vector<16x1xf32>
    %151 = arith.divf %149, %150 : vector<16x1xf32>
    %152 = vector.broadcast %151 : vector<16x1xf32> to vector<16x32xf32>
    %153 = arith.subf %147, %152 : vector<16x32xf32>
    %154 = arith.mulf %153, %153 : vector<16x32xf32>
    %cst_40 = arith.constant dense<0.000000e+00> : vector<16xf32>
    %155 = vector.multi_reduction <add>, %154, %cst_40 [1] : vector<16x32xf32> to vector<16xf32>
    %156 = vector.shape_cast %155 : vector<16xf32> to vector<16x1xf32>
    %cst_41 = arith.constant 3.200000e+01 : f32
    %157 = vector.broadcast %cst_41 : f32 to vector<16x1xf32>
    %158 = arith.divf %156, %157 : vector<16x1xf32>
    %159 = vector.broadcast %151 : vector<16x1xf32> to vector<16x32xf32>
    %160 = arith.subf %147, %159 : vector<16x32xf32>
    %cst_42 = arith.constant 9.99999974E-6 : f32
    %161 = vector.broadcast %cst_42 : f32 to vector<16x1xf32>
    %162 = arith.addf %158, %161 : vector<16x1xf32>
    %163 = math.rsqrt %162 : vector<16x1xf32>
    %164 = vector.broadcast %163 : vector<16x1xf32> to vector<16x32xf32>
    %165 = arith.mulf %160, %164 : vector<16x32xf32>
    %c176 = arith.constant 176 : index
    %c0_43 = arith.constant 0 : index
    %166 = vector.load %arg2[%c176, %c0_43] : memref<192x192xf32, #tpu.memory_space<vmem>>, vector<1x32xf32>
    %167 = vector.shape_cast %166 : vector<1x32xf32> to vector<1x32xf32>
    %168 = vector.broadcast %167 : vector<1x32xf32> to vector<16x32xf32>
    %169 = arith.mulf %165, %168 : vector<16x32xf32>
    %c177 = arith.constant 177 : index
    %c0_44 = arith.constant 0 : index
    %170 = vector.load %arg2[%c177, %c0_44] : memref<192x192xf32, #tpu.memory_space<vmem>>, vector<1x32xf32>
    %171 = vector.shape_cast %170 : vector<1x32xf32> to vector<1x32xf32>
    %172 = vector.broadcast %171 : vector<1x32xf32> to vector<16x32xf32>
    %173 = arith.addf %169, %172 : vector<16x32xf32>
    %c0_45 = arith.constant 0 : index
    %c0_46 = arith.constant 0 : index
    %c0_47 = arith.constant 0 : index
    %174 = vector.load %arg3[%c0_45, %c0_46, %c0_47] : memref<1x16x32xf32, #tpu.memory_space<vmem>>, vector<1x16x32xf32>
    %175 = vector.shape_cast %174 : vector<1x16x32xf32> to vector<16x32xf32>
    %176 = vector.shape_cast %173 : vector<16x32xf32> to vector<1x16x32xf32>
    tpu.vector_store %arg3[%c0_45, %c0_46, %c0_47], %176 {strides = array<i32>} : memref<1x16x32xf32, #tpu.memory_space<vmem>>, vector<1x16x32xf32>,
    return
  }
  func.func @transform_0(%arg0: i32) -> (i32, i32, i32) {
    %c0_i32 = arith.constant 0 : i32
    %c0_i32_0 = arith.constant 0 : i32
    %c0_i32_1 = arith.constant 0 : i32
    return %arg0, %c0_i32, %c0_i32_0 : i32, i32, i32
  }
  func.func @transform_1(%arg0: i32) -> (i32, i32) {
    %c0_i32 = arith.constant 0 : i32
    %c0_i32_0 = arith.constant 0 : i32
    %c0_i32_1 = arith.constant 0 : i32
    return %c0_i32, %c0_i32_0 : i32, i32
  }
  func.func @transform_2(%arg0: i32) -> (i32, i32, i32) {
    %c0_i32 = arith.constant 0 : i32
    %c0_i32_0 = arith.constant 0 : i32
    %c0_i32_1 = arith.constant 0 : i32
    return %arg0, %c0_i32, %c0_i32_0 : i32, i32, i32
  }
}

</mosaic_0001>

<bundles_post_ra>
// kernel: tpu_custom_call.1
= control target key start
LH: loop header
LB: loop body
LE: loop exit
PB: predicated region body
PF: predicated region fallthrough
CT: control target
= control target key end

     0   :  { %7 = vsyncpa [#allocation3], 0  ;;  %s1942_s0 = inlined_call_operand.vmem [shape: f32[8,18,32], index: 0, kind: input, shape index: {}]   ;;  %s1943_s1 = inlined_call_operand.hbm [shape: f32[192,192], index: 1, kind: input, shape index: {}]   ;;  %s1944_s2 = inlined_call_operand.hbm [shape: f32[8,16,32], index: 2, kind: output, shape index: {}]  }
   0x1   :  { %8 = vsyncpa [#allocation4], 0 }
   0x2   :  { %10 = vsyncpa [#allocation4 + $0x1], 0  ;;  %s1653_s9 = smov 0   ;;  %s1655_s10 = smov 0  }
   0x3   :  { %s1657_s11 = smov 0   ;;  %s1659_s12 = smov 0  }
   0x4 LB: > { %s1674_s13 = sadd.s32 4294967295, %s1627_s12   ;;  %s1180_s14 = sadd.s32 4294967294, %s1627_s12   ;;  %s1627_s12 = sphi %s1659_s12, %s1960_s12   ;;  %s1623_s11 = sphi %s1657_s11, %s1959_s11   ;;  %s1619_s10 = sphi %s1655_s10, %s1958_s10   ;;  %s1615_s9 = sphi %s1653_s9, %s1957_s9  }
   0x5   : > { %s1678_s15 = sadd.s32 1, %s1627_s12   ;;  %s70_s16 = sadd.s32 1, %s1623_s11 }
   0x6   : > { %s67_s17 = ssub.s32 %s1627_s12, %s1678_s15  ;;  %p80_p0 = scmp.ne.s32.totalorder %s1623_s11, %s1619_s10 }
   0x7   : > { %p68_p1 = scmp.eq.s32.totalorder %s67_s17, 0  ;;  %p81_p2 = scmp.eq.s32.totalorder %s1674_s13, 7 }
   0x8   : > { %p86_p3 = scmp.ne.s32.totalorder %s1619_s10, %s1615_s9  ;;  %p87_p4 = scmp.eq.s32.totalorder %s1180_s14, 7 }
   0x9   : > { %s1689_s18 = scalar_select %p68_p1, %s1623_s11, %s70_s16  }
   0xa   : > { %p1691_p5 = por %p81_p2, %p80_p0  ;;  %p1695_p6 = por %p87_p4, %p86_p3 }
   0xb   : > { %p1181_p7 = scmp.ge.s32.totalorder %s1627_s12, 1  ;;  %p94_p8 = scmp.lt.s32.totalorder %s1627_s12, 9 }
   0xc   : > { %s1948_s19 = scalar_select %p1691_p5, 1, 0 }
   0xd   : > { %s1949_s20 = scalar_select %p1695_p6, 1, 0 }
   0xe   : > { %p1945_p9 = scmp.eq.s32.totalorder %s1674_s13, 0  ;;  %p1702_p10 = pnand %p1181_p7, %p94_p8 }
   0xf   : > { %s1629_s22 = smov [#allocation2]   ;;  %s1533_s27 = scalar_lea.hbm %s1943_s1, 6144 }
  0x10   : > { %s1950_s21 = scalar_select %p1702_p10, 1, 0 }
  0x11   : > { %s106_s23 = sshll.u32 %s1629_s22, 4  ;;  %p1411_p11 = pneg %p1702_p10  ;;  %s107_s23 = int_to_ptr.vmem [resolvable:$true] %s106_s23 }
  0x12   : > { %p1534_p13 = scmp.ne.s32.totalorder %s1943_s1, %s1533_s27  ;;  %p1540_p3 = scmp.lt.u32.totalorder %s1533_s27, %s1943_s1 }
  0x13   : > { %p1710_p12 = pnand %p1945_p9, %p1411_p11 }
  0x15   : > { %p1535_p0 = pneg %p1710_p12 }
  0x17   : > { %p1536_p1 = pnand %p1535_p0, %p1534_p13 }
  0x19   : > { %p1537_p2 = pneg %p1536_p1 }
  0x1b   : > { %p1542_p4 = pnand %p1540_p3, %p1537_p2 }
  0x1d   : > { %1545 = shalt.err (!%p1542_p4)
}
  0x1e   : > { %s1546_s4 = scalar_lea.vmem %s107_s23, 6144  ;;  %p1554_p9 = scmp.lt.s32.totalorder %s107_s23, %s107_s23 }
  0x1f   : > { %p1547_p7 = scmp.ne.s32.totalorder %s107_s23, %s1546_s4  ;;  %p1555_p6 = scmp.lt.s32.totalorder %s1546_s4, %s1546_s4 }
  0x21   : > { %p1549_p8 = pnand %p1547_p7, %p1535_p0  ;;  %p1556_p5 = por %p1555_p6, %p1554_p9 }
  0x23   : > { %p1550_p11 = pneg %p1549_p8 }
  0x25   : > { %p1557_p10 = pnand %p1556_p5, %p1550_p11 }
  0x27   : > { %1560 = shalt.err (!%p1557_p10)
}
  0x28   : > { %s1630_s5 = smov 256   ;;  %s1631_s6 = smov 16  }
  0x29   : > { %1414 = dma.hbm_to_vmem [thread:$0]  (!%p1710_p12), %s1943_s1, 6144, %s107_s23, [#allocation3], %s1630_s5, %s1630_s5, %s1631_s6  }
  0x2a   : > { %p1952_p13 = scmp.ne.s32.totalorder %s1950_s21, 0 }
  0x2b   : > { %p1953_p1 = scmp.eq.s32.totalorder (!%p1952_p13), %s1674_s13, 0 }
  0x2c   : > { %130 = sbr.rel (%p1952_p13) target bundleno = 2607 (0xa2f), region = 28 }
  0x33   : > { %1606 = dma.done.wait (%p1953_p1), [#allocation3], 6144   ;;  %p1954_p0 = pmov %p1953_p1 }
  0x34   : > { %p152_p5 = scmp.lt.s32.totalorder %s1674_s13, 7  ;;  %vm164_vm0 = vcmask 261120   ;;  %v1743_v0 = vld [vmem:[#allocation2] sm:$0xff]  ;;  %v1745_v1 = vld [vmem:[#allocation2 + $0x10] sm:$0xff]  ;;  %s1632_s21 = smov 64   ;;  %vm340_vm1 = vcmask 1041408  }
  0x35   : > { %1608 = vsyncadd (%p1954_p0), [#allocation3], 4294961152  ;;  %v1747_v2 = vld [vmem:[#allocation2 + $0x20] sm:$0xff]  ;;  %v1467_v3 = vpack.i.bf16 %v1745_v1, %v1743_v0  ;;  %v1352_v4 = vpack.c.bf16 %v1745_v1, %v1743_v0  ;;  %v1753_v5 = vld [vmem:[#allocation2 + $0x30] sm:$0xff]  ;;  %vm342_vm2 = vcmask 1043456   ;;  %vm344_vm3 = vcmask 1045504  }
  0x36   : > { %s153_s14 = scalar_select %p152_p5, %s1674_s13, 7  ;;  %v1356_v7 = vpack.c.bf16 %v1753_v5, %v1747_v2  ;;  %v258_v8 = vld [vmem:[#allocation2 + $0x152] ss:$0 sm:$0xff]  ;;  %v246_v10 = vld [vmem:[#allocation2 + $0x150] ss:$0 sm:$0xff]  ;;  %vm1361_vm4 = vmpackc.low %vm164_vm0, %vm164_vm0  ;;  %vm504_vm5 = vcmask 130048  }
  0x37   : > { %1353 = vmatprep.subr.bf16.mxu0 %v1352_v4  ;;  %260 = vrot.lane.b32.xlu0 %v258_v8, %s1632_s21  ;;  %v1777_v17 = vld [vmem:[#allocation2 + $0x140] ss:$0 sm:$0xff]  ;;  %v1779_v18 = vld [vmem:[#allocation2 + $0x141] ss:$0 sm:$0xff]  ;;  %v265_v30 = vld [vmem:[#allocation2 + $0x154] ss:$0 sm:$0xff] }
  0x38   : > { %s1404_s16 = smul.u32 24, %s153_s14  ;;  %1355 = vmatpush3.bf16.msra.mxu0 %v1352_v4  ;;  %s1633_s23 = smov 32   ;;  %vm974_vm6 = vcmask 523264  }
  0x39   : > { %1357 = vmatprep.subr.bf16.mxu0 %v1356_v7  ;;  %s1634_s25 = smov 96   ;;  %s149_s26 = sand.u32 1, %s1619_s10  }
  0x3a   : > { %s1741_s24 = scalar_lea.vmem %s1942_s0, %s1404_s16  ;;  %s1186_s27 = sshll.u32 %s149_s26, 4 }
  0x3b   : > { %v1756_v6 = vld [vmem:[%s1741_s24] sm:$0xff]  ;;  %v1764_v9 = vld [vmem:[%s1741_s24 + $0x8] sm:$0xff]  ;;  %v159_v29 = vld [vmem:[%s1741_s24 + $0x10] sm:$0x3]  ;;  %s1219_s28 = sshll.u32 %s1674_s13, 8  ;;  %s151_s29 = scalar_lea.vmem [#allocation5], %s1186_s27 }
  0x3c   : > { %1276 = vmatprep.mubr.msk.f32.mxu0 %vm164_vm0, %v1756_v6  ;;  %1359 = vmatpush3.bf16.msra.mxu0 %v1356_v7  ;;  %v266_v31 = vmul.f32 %v265_v30, %v159_v29  ;;  %s1106_s30 = sshll.u32 %s151_s29, 4  ;;  %s1896_s5 = scalar_lea.hbm %s1944_s2, %s1219_s28  ;;  %s1898_s30 = int_to_ptr.vmem [resolvable:$true] %s1106_s30 }
  0x3d   : > { %s1901_s6 = scalar_lea.sflag [#allocation4], %s149_s26  ;;  %s1561_s13 = scalar_lea.vmem %s1898_s30, 256 }
  0x3e   : > { %p1562_p6 = scmp.ne.s32.totalorder %s1898_s30, %s1561_s13  ;;  %p1955_p9 = scmp.ne.s32.totalorder %s1948_s19, 0 }
  0x3f   : > { %1277 = vmatmul.mubr.msk.f32.vlgmr.msra.gmra.mrb[0].mxu0 %vm164_vm0, %v1764_v9  ;;  %s1635_s7 = smov [#allocation5]  }
  0x40   : > { %p1563_p10 = pnand %p1562_p6, %p1955_p9  ;;  %s1565_s8 = sshll.u32 %s1635_s7, 4  ;;  %s1566_s8 = int_to_ptr.vmem [resolvable:$false] %s1565_s8 }
  0x41   : > { %s1567_s14 = scalar_lea.vmem %s1566_s8, 512  ;;  %p1568_p2 = scmp.lt.s32.totalorder %s1898_s30, %s1566_s8 }
  0x42   : > { %p1564_p12 = pneg %p1563_p10  ;;  %p1569_p3 = scmp.lt.s32.totalorder %s1567_s14, %s1561_s13 }
  0x44   : > { %p1570_p4 = por %p1569_p3, %p1568_p2 }
  0x46   : > { %p1571_p7 = pnand %p1570_p4, %p1564_p12 }
  0xa9   : > { %v261_v11 = vpop.permute.xlu0 %260 }
 0x112   : > { %v1768_v12 = vpop.f32.mrb[0].mxu0 }
 0x113   : > { %v1771_v13 = vadd.f32 %v1768_v12, %v246_v10  ;;  %v1773_v14 = vpop.f32.mrb[1].mxu0  ;;  %v264_v21 = vadd.f32 %v1768_v12, %v261_v11 }
 0x114   : > { %v247_v15 = vadd.f32 %v246_v10, %v1773_v14  ;;  %v263_v16 = vadd.f32 %v261_v11, %v1773_v14 }
 0x115   : > { %v302_v26 = vrot.slane %v264_v21, 2  ;;  %v316_v27 = vrot.slane %v264_v21, 6  ;;  %v309_v28 = vrot.slane %v264_v21, 4 }
 0x116   : > { %v1781_v19 = vmul.f32 0.125, %v247_v15  ;;  %268 = vrot.lane.b32.xlu0 %v263_v16, %s1632_s21  ;;  %v274_v20 = vrot.slane %v263_v16, 2  ;;  %v288_v22 = vrot.slane %v263_v16, 6  ;;  %v281_v25 = vrot.slane %v263_v16, 4 }
 0x118   : > { %275 = vrot.lane.b32.xlu1 %v274_v20, %s1632_s21  ;;  %v353_v23 = vmul.f32 %v1777_v17, %v1781_v19  ;;  %v355_v24 = vmul.f32 %v1779_v18, %v1781_v19 }
 0x11a   : > { %289 = vrot.lane.b32.xlu0 %v288_v22, %s1632_s21  ;;  %1283 = vmatprep.mubr.msk.f32.mxu0 %vm164_vm0, %v353_v23 }
 0x11b   : > { %1286 = vmatprep.mubr.msk.f32.mxu1 %vm164_vm0, %v355_v24 }
 0x11c   : > { %282 = vrot.lane.b32.xlu1 %v281_v25, %s1632_s21  ;;  %v250_v25 = vmul.f32 0.125, %v1771_v13 }
 0x11e   : > { %303 = vrot.lane.b32.xlu0 %v302_v26, %s1632_s21  ;;  %v1808_v26 = vld [vmem:[#allocation2 + $0x142] ss:$0 sm:$0xff] }
 0x11f   : > { %v357_v29 = vmul.f32 %v1808_v26, %v1781_v19 }
 0x120   : > { %296 = vrot.lane.b32.xlu1 %v264_v21, %s1632_s21 }
 0x122   : > { %317 = vrot.lane.b32.xlu0 %v316_v27, %s1632_s21  ;;  %v354_v27 = vmul.f32 %v1777_v17, %v250_v25 }
 0x124   : > { %310 = vrot.lane.b32.xlu1 %v309_v28, %s1632_s21  ;;  %v356_v28 = vmul.f32 %v1779_v18, %v250_v25 }
 0x188   : > { %v269_v32 = vpop.permute.xlu0 %268 }
 0x189   : > { %v271_v33 = vadd.f32 %v269_v32, %v266_v31  ;;  %v358_v31 = vmul.f32 %v1808_v26, %v250_v25 }
 0x18a   : > { %v276_v36 = vpop.permute.xlu1 %275 }
 0x18b   : > { %1477 = vtanh.f32 %v271_v33  ;;  %v362_v33 = vld [vmem:[#allocation2 + $0xd0] sm:$0xff] }
 0x18c   : > { %v290_v47 = vpop.permute.xlu0 %289 }
 0x18e   : > { %v283_v41 = vpop.permute.xlu1 %282 }
 0x190   : > { %v304_v58 = vpop.permute.xlu0 %303 }
 0x192   : > { %v297_v53 = vpop.permute.xlu1 %296 }
 0x194   : > { %v318_v8 = vpop.permute.xlu0 %317 }
 0x195   : > { %v1478_v34 = vpop.eup %1477 }
 0x196   : > { %v273_v35 = vmul.f32 %v1478_v34, %v265_v30  ;;  %v311_v62 = vpop.permute.xlu1 %310 }
 0x198   : > { %v278_v37 = vadd.f32 %v276_v36, %v273_v35 }
 0x19a   : > { %1479 = vtanh.f32 %v278_v37  ;;  %v363_v37 = vld [vmem:[#allocation2 + $0xe0] sm:$0xff] }
 0x1a4   : > { %v1480_v38 = vpop.eup %1479 }
 0x1a5   : > { %v323_v39 = vrot.slane %v1480_v38, 6  ;;  %v280_v40 = vmul.f32 %v1480_v38, %v265_v30 }
 0x1a7   : > { %v285_v42 = vadd.f32 %v283_v41, %v280_v40  ;;  %v341_v43 = vsel %vm340_vm1, %v1478_v34, %v323_v39  ;;  %v361_v34 = vld [vmem:[#allocation2 + $0xc0] sm:$0xff]  ;;  %v364_v39 = vld [vmem:[#allocation2 + $0xf0] sm:$0xff] }
 0x1a9   : > { %1481 = vtanh.f32 %v285_v42 }
 0x1b3   : > { %v1482_v44 = vpop.eup %1481 }
 0x1b4   : > { %v287_v45 = vmul.f32 %v1482_v44, %v265_v30  ;;  %v326_v46 = vrot.slane %v1482_v44, 4 }
 0x1b6   : > { %v292_v48 = vadd.f32 %v290_v47, %v287_v45  ;;  %v343_v49 = vsel %vm342_vm2, %v341_v43, %v326_v46  ;;  %v365_v46 = vld [vmem:[#allocation2 + $0x100] sm:$0xff] }
 0x1b8   : > { %1483 = vtanh.f32 %v292_v48  ;;  %v366_v48 = vld [vmem:[#allocation2 + $0x110] sm:$0xff] }
 0x1c2   : > { %v1484_v50 = vpop.eup %1483 }
 0x1c3   : > { %v294_v51 = vmul.f32 %v1484_v50, %v265_v30  ;;  %v329_v52 = vrot.slane %v1484_v50, 2 }
 0x1c5   : > { %v299_v54 = vadd.f32 %v297_v53, %v294_v51  ;;  %v345_v55 = vsel %vm344_vm3, %v343_v49, %v329_v52 }
 0x1c7   : > { %1485 = vtanh.f32 %v299_v54  ;;  %v367_v54 = vld [vmem:[#allocation2 + $0x120] sm:$0xff] }
 0x1d1   : > { %v1486_v56 = vpop.eup %1485 }
 0x1d2   : > { %v301_v57 = vmul.f32 %v1486_v56, %v265_v30 }
 0x1d4   : > { %v306_v59 = vadd.f32 %v304_v58, %v301_v57 }
 0x1d6   : > { %1487 = vtanh.f32 %v306_v59 }
 0x1e0   : > { %v1488_v60 = vpop.eup %1487 }
 0x1e1   : > { %v308_v61 = vmul.f32 %v1488_v60, %v265_v30  ;;  %v332_v11 = vrot.slane %v1488_v60, 6 }
 0x1e3   : > { %v313_v63 = vadd.f32 %v311_v62, %v308_v61  ;;  %v346_v21 = vsel %vm340_vm1, %v1486_v56, %v332_v11  ;;  %v368_v56 = vld [vmem:[#allocation2 + $0x130] sm:$0xff] }
 0x1e5   : > { %1489 = vtanh.f32 %v313_v63 }
 0x1ef   : > { %v1490_v4 = vpop.eup %1489 }
 0x1f0   : > { %v315_v7 = vmul.f32 %v1490_v4, %v265_v30  ;;  %v335_v15 = vrot.slane %v1490_v4, 4  ;;  %v1816_v30 = vld [vmem:[#allocation2 + $0x143] ss:$0 sm:$0xff]  ;;  %v251_v4 = vld [vmem:[#allocation2 + $0x151] ss:$0 sm:$0xff] }
 0x1f1   : > { %v359_v13 = vmul.f32 %v1816_v30, %v1781_v19  ;;  %v360_v32 = vmul.f32 %v1816_v30, %v250_v25 }
 0x1f2   : > { %v320_v10 = vadd.f32 %v318_v8, %v315_v7  ;;  %v347_v22 = vsel %vm342_vm2, %v346_v21, %v335_v15 }
 0x1f4   : > { %1491 = vtanh.f32 %v320_v10 }
 0x1fe   : > { %v1492_v16 = vpop.eup %1491 }
 0x1ff   : > { %v338_v20 = vrot.slane %v1492_v16, 2 }
 0x201   : > { %v348_v23 = vsel %vm344_vm3, %v347_v22, %v338_v20 }
 0x202   : > { %v1360_v24 = vpack.c.bf16 %v348_v23, %v345_v55 }
 0x204   : > { %1362 = vmatprep.subr.msk.bf16.mxu0 %vm1361_vm4, %v1360_v24  ;;  %1402 = vmatprep.subr.msk.bf16.mxu1 %vm1361_vm4, %v1360_v24 }
 0x205   : > { %1365 = vmatpush3.bf16.xpose.msk.msra.mxu0 %vm1361_vm4, %v1360_v24  ;;  %1403 = vmatpush3.bf16.xpose.msk.msra.mxu1 %vm1361_vm4, %v1360_v24 }
 0x20c   : > { %1284 = vmatmul.mubr.msk.f32.vlgmr.msra.gmra.mrb[2].mxu0 %vm164_vm0, %v354_v27  ;;  %1287 = vmatmul.mubr.msk.f32.vlgmr.msra.gmra.mrb[0].mxu1 %vm164_vm0, %v356_v28 }
 0x20d   : > { %1289 = vmatprep.mubr.msk.f32.mxu1 %vm164_vm0, %v357_v29 }
 0x210   : > { %1290 = vmatmul.mubr.msk.f32.gmra.mrb[2].mxu1 %vm164_vm0, %v358_v31 }
 0x211   : > { %1292 = vmatprep.mubr.msk.f32.mxu1 %vm164_vm0, %v359_v13 }
 0x214   : > { %1293 = vmatmul.mubr.msk.f32.gmra.mrb[4].mxu1 %vm164_vm0, %v360_v32 }
 0x2df   : > { %v1285_v35 = vpop.f32.mrb[2].mxu0  ;;  %v1288_v36 = vpop.f32.mrb[0].mxu1 }
 0x2e0   : > { %v471_v38 = vadd.f32 %v1285_v35, %v362_v33  ;;  %v465_v40 = vpop.f32.mrb[3].mxu0  ;;  %v475_v41 = vpop.f32.mrb[1].mxu1  ;;  %v481_v44 = vadd.f32 %v1288_v36, %v364_v39 }
 0x2e1   : > { %v466_v42 = vadd.f32 %v465_v40, %v361_v34  ;;  %v476_v19 = vadd.f32 %v475_v41, %v363_v37 }
 0x2e2   : > { %v508_v43 = vsel %vm504_vm5, %v471_v38, -inf  ;;  %v514_v55 = vsel %vm504_vm5, %v481_v44, -inf }
 0x2e3   : > { %v1291_v45 = vpop.f32.mrb[2].mxu1  ;;  %509 = vmax.xlane.f32.xlu0 %v508_v43  ;;  %v505_v47 = vsel %vm504_vm5, %v466_v42, -inf  ;;  %v511_v51 = vsel %vm504_vm5, %v476_v19, -inf }
 0x2e4   : > { %v485_v49 = vpop.f32.mrb[3].mxu1  ;;  %506 = vmax.xlane.f32.xlu1 %v505_v47  ;;  %v491_v52 = vadd.f32 %v1291_v45, %v366_v48 }
 0x2e5   : > { %v486_v50 = vadd.f32 %v485_v49, %v365_v46 }
 0x2e6   : > { %v520_v61 = vsel %vm504_vm5, %v491_v52, -inf }
 0x2e7   : > { %v1294_v53 = vpop.f32.mrb[4].mxu1  ;;  %512 = vmax.xlane.f32.xlu0 %v511_v51  ;;  %v517_v59 = vsel %vm504_vm5, %v486_v50, -inf }
 0x2e8   : > { %v495_v57 = vpop.f32.mrb[5].mxu1  ;;  %515 = vmax.xlane.f32.xlu1 %v514_v55  ;;  %v501_v60 = vadd.f32 %v1294_v53, %v368_v56  ;;  %v1472_v56 = vpack.i.bf16 %v1753_v5, %v1747_v2 }
 0x2e9   : > { %v496_v58 = vadd.f32 %v495_v57, %v367_v54 }
 0x2ea   : > { %v526_v63 = vsel %vm504_vm5, %v501_v60, -inf }
 0x2eb   : > { %518 = vmax.xlane.f32.xlu0 %v517_v59  ;;  %v523_v62 = vsel %vm504_vm5, %v496_v58, -inf }
 0x2ec   : > { %521 = vmax.xlane.f32.xlu1 %v520_v61 }
 0x2ef   : > { %524 = vmax.xlane.f32.xlu0 %v523_v62 }
 0x2f0   : > { %527 = vmax.xlane.f32.xlu1 %v526_v63 }
 0x305   : > { %253 = vrot.lane.b32.xlu0 %v251_v4, %s1633_s23 }
 0x370   : > { %v510_v7 = vpop.xlane.xlu0 %509 }
 0x371   : > { %v530_v8 = vsub.f32 %v471_v38, %v510_v7  ;;  %v507_v10 = vpop.xlane.xlu1 %506 }
 0x372   : > { %v529_v15 = vsub.f32 %v466_v42, %v507_v10 }
 0x373   : > { %v539_v11 = vmul.f32 1.442695, %v530_v8 }
 0x374   : > { %v513_v16 = vpop.xlane.xlu0 %512  ;;  %v537_v22 = vmul.f32 1.442695, %v529_v15 }
 0x375   : > { %1493 = vpow2.f32 %v539_v11  ;;  %v516_v20 = vpop.xlane.xlu1 %515  ;;  %v531_v23 = vsub.f32 %v476_v19, %v513_v16 }
 0x376   : > { %v532_v21 = vsub.f32 %v481_v44, %v516_v20 }
 0x377   : > { %v541_v28 = vmul.f32 1.442695, %v531_v23 }
 0x378   : > { %v543_v24 = vmul.f32 1.442695, %v532_v21  ;;  %v519_v25 = vpop.xlane.xlu0 %518 }
 0x379   : > { %v522_v27 = vpop.xlane.xlu1 %521  ;;  %v533_v34 = vsub.f32 %v486_v50, %v519_v25 }
 0x37a   : > { %1495 = vpow2.f32 %v543_v24  ;;  %v534_v29 = vsub.f32 %v491_v52, %v522_v27 }
 0x37b   : > { %1497 = vpow2.f32 %v537_v22  ;;  %v545_v19 = vmul.f32 1.442695, %v533_v34 }
 0x37c   : > { %v525_v31 = vpop.xlane.xlu0 %524  ;;  %1499 = vpow2.f32 %v541_v28  ;;  %v547_v35 = vmul.f32 1.442695, %v534_v29 }
 0x37d   : > { %v535_v13 = vsub.f32 %v496_v58, %v525_v31  ;;  %v528_v38 = vpop.xlane.xlu1 %527 }
 0x37e   : > { %v536_v43 = vsub.f32 %v501_v60, %v528_v38 }
 0x37f   : > { %v1835_v32 = vpop.eup %1493  ;;  %v549_v33 = vmul.f32 1.442695, %v535_v13 }
 0x380   : > { %v254_v36 = vpop.permute.xlu0 %253  ;;  %v556_v37 = vsel %vm504_vm5, %v1835_v32, 0.0  ;;  %v551_v46 = vmul.f32 1.442695, %v536_v43 }
 0x381   : > { %1501 = vpow2.f32 %v549_v33  ;;  %v256_v39 = vadd.f32 %v254_v36, %v1773_v14  ;;  %v257_v40 = vadd.f32 %v1768_v12, %v254_v36  ;;  %557 = vadd.xlane.f32.xlu1 %v556_v37 }
 0x382   : > { %1503 = vpow2.f32 %v547_v35 }
 0x383   : > { %v1462_v41 = vpack.i.bf16 %v257_v40, %v256_v39  ;;  %1505 = vpow2.f32 %v545_v19 }
 0x384   : > { %v1841_v42 = vpop.eup %1495  ;;  %1507 = vpow2.f32 %v551_v46 }
 0x385   : > { %v562_v44 = vsel %vm504_vm5, %v1841_v42, 0.0  ;;  %v1498_v45 = vpop.eup %1497 }
 0x386   : > { %563 = vadd.xlane.f32.xlu1 %v562_v44  ;;  %v553_v47 = vsel %vm504_vm5, %v1498_v45, 0.0  ;;  %v1500_v48 = vpop.eup %1499 }
 0x387   : > { %v559_v49 = vsel %vm504_vm5, %v1500_v48, 0.0 }
 0x38a   : > { %554 = vadd.xlane.f32.xlu1 %v553_v47 }
 0x38b   : > { %v1502_v14 = vpop.eup %1501 }
 0x38c   : > { %v571_v12 = vsel %vm504_vm5, %v1502_v14, 0.0  ;;  %v1504_v50 = vpop.eup %1503 }
 0x38d   : > { %572 = vadd.xlane.f32.xlu0 %v571_v12  ;;  %v568_v51 = vsel %vm504_vm5, %v1504_v50, 0.0  ;;  %v1506_v52 = vpop.eup %1505 }
 0x38e   : > { %560 = vadd.xlane.f32.xlu1 %v559_v49  ;;  %v565_v53 = vsel %vm504_vm5, %v1506_v52, 0.0  ;;  %v1508_v54 = vpop.eup %1507 }
 0x38f   : > { %v574_v55 = vsel %vm504_vm5, %v1508_v54, 0.0 }
 0x392   : > { %569 = vadd.xlane.f32.xlu1 %v568_v51 }
 0x396   : > { %566 = vadd.xlane.f32.xlu1 %v565_v53 }
 0x39a   : > { %575 = vadd.xlane.f32.xlu1 %v574_v55 }
 0x3ab   : > { %1463 = vrot.lane.b32.xlu1 %v1462_v41, %s1634_s25 }
 0x3af   : > { %1468 = vrot.lane.b32.xlu1 %v1467_v3, %s1633_s23 }
 0x3b3   : > { %1473 = vrot.lane.b32.xlu1 %v1472_v56, %s1633_s23 }
 0x40e   : > { %v558_v57 = vpop.xlane.xlu1 %557 }
 0x413   : > { %v564_v58 = vpop.xlane.xlu1 %563 }
 0x417   : > { %v555_v59 = vpop.xlane.xlu1 %554 }
 0x418   : > { %1509 = vrcp.f32 %v555_v59 }
 0x419   : > { %1511 = vrcp.f32 %v558_v57 }
 0x41a   : > { %v573_v1 = vpop.xlane.xlu0 %572 }
 0x41b   : > { %v561_v60 = vpop.xlane.xlu1 %560 }
 0x41c   : > { %1513 = vrcp.f32 %v561_v60 }
 0x41d   : > { %1515 = vrcp.f32 %v564_v58 }
 0x41f   : > { %v570_v61 = vpop.xlane.xlu1 %569 }
 0x422   : > { %v1510_v62 = vpop.eup %1509 }
 0x423   : > { %v567_v63 = vpop.xlane.xlu1 %566  ;;  %v578_v4 = vmul.f32 %v1510_v62, %v1498_v45  ;;  %v1512_v8 = vpop.eup %1511 }
 0x424   : > { %1517 = vrcp.f32 %v567_v63  ;;  %v580_v11 = vmul.f32 %v1512_v8, %v1835_v32  ;;  %v878_v8 = vld [vmem:[#allocation2 + $0x18] sm:$0xff] }
 0x425   : > { %1299 = vmatprep.mubr.msk.f32.mxu0 %vm504_vm5, %v578_v4  ;;  %1519 = vrcp.f32 %v570_v61 }
 0x426   : > { %1521 = vrcp.f32 %v573_v1  ;;  %v1514_v10 = vpop.eup %1513 }
 0x427   : > { %v576_v0 = vpop.xlane.xlu1 %575  ;;  %v1516_v15 = vpop.eup %1515  ;;  %v582_v16 = vmul.f32 %v1514_v10, %v1500_v48 }
 0x428   : > { %1523 = vrcp.f32 %v576_v0  ;;  %v584_v21 = vmul.f32 %v1516_v15, %v1841_v42  ;;  %v880_v15 = vld [vmem:[#allocation2 + $0x38] sm:$0xff] }
 0x42b   : > { %v1464_v2 = vpop.permute.xlu1 %1463 }
 0x42c   : > { %v1466_v3 = vunpack.i.h.bf16 %v1464_v2  ;;  %v1465_v5 = vunpack.i.l.bf16 %v1464_v2 }
 0x42e   : > { %v1366_v7 = vpack.c.bf16 %v1466_v3, %v1465_v5  ;;  %v1518_v20 = vpop.eup %1517 }
 0x42f   : > { %v1520_v22 = vpop.eup %1519  ;;  %v586_v23 = vmul.f32 %v1518_v20, %v1506_v52  ;;  %v1469_v31 = vpop.permute.xlu1 %1468  ;;  %v965_v20 = vld [vmem:[#allocation2 + $0x40] sm:$0xff] }
 0x430   : > { %1367 = vmatprep.subr.bf16.mxu0 %v1366_v7  ;;  %v1522_v24 = vpop.eup %1521  ;;  %v588_v25 = vmul.f32 %v1520_v22, %v1504_v50  ;;  %v1471_v13 = vunpack.i.h.bf16 %v1469_v31  ;;  %v1470_v32 = vunpack.i.l.bf16 %v1469_v31  ;;  %v967_v22 = vld [vmem:[#allocation2 + $0x60] sm:$0xff] }
 0x431   : > { %1369 = vmatpush3.bf16.msra.mxu0 %v1366_v7  ;;  %v590_v28 = vmul.f32 %v1522_v24, %v1502_v14  ;;  %v968_v24 = vld [vmem:[#allocation2 + $0x70] sm:$0xff] }
 0x432   : > { %v1524_v27 = vpop.eup %1523  ;;  %v1370_v33 = vpack.c.bf16 %v1471_v13, %v1470_v32 }
 0x433   : > { %v592_v29 = vmul.f32 %v1524_v27, %v1508_v54  ;;  %v1474_v34 = vpop.permute.xlu1 %1473  ;;  %v969_v27 = vld [vmem:[#allocation2 + $0x80] sm:$0xff] }
 0x434   : > { %1300 = vmatmul.mubr.msk.f32.vlgmr.msra.gmra.mrb[4].mxu0 %vm504_vm5, %v580_v11  ;;  %1371 = vmatprep.subr.bf16.mxu1 %v1370_v33  ;;  %v1476_v35 = vunpack.i.h.bf16 %v1474_v34  ;;  %v1475_v36 = vunpack.i.l.bf16 %v1474_v34  ;;  %v879_v11 = vld [vmem:[#allocation2 + $0x28] sm:$0xff] }
 0x435   : > { %1302 = vmatprep.mubr.msk.f32.mxu0 %vm504_vm5, %v582_v16  ;;  %1373 = vmatpush3.bf16.msra.mxu1 %v1370_v33  ;;  %v1382_v16 = vpack.c.bf16 %v880_v15, %v879_v11  ;;  %v1084_v11 = vld [vmem:[#allocation2 + $0x160] ss:$0 sm:$0xff] }
 0x436   : > { %v1374_v37 = vpack.c.bf16 %v1476_v35, %v1475_v36 }
 0x438   : > { %1303 = vmatmul.mubr.msk.f32.gmra.mrb[6].mxu0 %vm504_vm5, %v584_v21  ;;  %1375 = vmatprep.subr.bf16.mxu1 %v1374_v37  ;;  %v966_v21 = vld [vmem:[#allocation2 + $0x50] sm:$0xff] }
 0x439   : > { %1305 = vmatprep.mubr.msk.f32.mxu0 %vm504_vm5, %v586_v23  ;;  %1377 = vmatpush3.bf16.msra.mxu1 %v1374_v37  ;;  %v1386_v23 = vpack.c.bf16 %v966_v21, %v965_v20  ;;  %v871_v37 = vld [vmem:[#allocation2 + $0x155] ss:$0 sm:$0xff] }
 0x43b   : > { %1387 = vmatprep.subr.bf16.mxu1 %v1386_v23 }
 0x43c   : > { %1306 = vmatmul.mubr.msk.f32.gmra.mrb[8].mxu0 %vm504_vm5, %v588_v25  ;;  %v1390_v25 = vpack.c.bf16 %v968_v24, %v967_v22 }
 0x43d   : > { %1308 = vmatprep.mubr.msk.f32.mxu0 %vm504_vm5, %v590_v28  ;;  %v970_v28 = vld [vmem:[#allocation2 + $0x90] sm:$0xff] }
 0x440   : > { %1309 = vmatmul.mubr.msk.f32.gmra.mrb[10].mxu0 %vm504_vm5, %v592_v29  ;;  %v1394_v29 = vpack.c.bf16 %v970_v28, %v969_v27 }
 0x507   : > { %v1301_v38 = vpop.f32.mrb[4].mxu0 }
 0x508   : > { %v691_v39 = vpop.f32.mrb[5].mxu0  ;;  %v731_v41 = vmul.f32 %v1301_v38, %v1777_v17 }
 0x509   : > { %v730_v43 = vmul.f32 %v691_v39, %v1777_v17  ;;  %v874_v39 = vld [vmem:[#allocation2 + $0x156] ss:$0 sm:$0xff] }
 0x50b   : > { %v1304_v40 = vpop.f32.mrb[6].mxu0 }
 0x50c   : > { %v733_v42 = vmul.f32 %v1304_v40, %v1779_v18  ;;  %v701_v19 = vpop.f32.mrb[7].mxu0 }
 0x50d   : > { %v732_v44 = vmul.f32 %v701_v19, %v1779_v18  ;;  %v744_v18 = vld [vmem:[#allocation2 + $0x153] ss:$0 sm:$0xff] }
 0x50e   : > { %v735_v45 = vadd.f32 %v733_v42, %v731_v41 }
 0x50f   : > { %v734_v46 = vadd.f32 %v732_v44, %v730_v43  ;;  %v1307_v47 = vpop.f32.mrb[8].mxu0 }
 0x510   : > { %v737_v48 = vmul.f32 %v1307_v47, %v1808_v26  ;;  %v711_v14 = vpop.f32.mrb[9].mxu0 }
 0x511   : > { %v736_v12 = vmul.f32 %v711_v14, %v1808_v26 }
 0x512   : > { %v739_v49 = vadd.f32 %v737_v48, %v735_v45  ;;  %v971_v45 = vld [vmem:[#allocation2 + $0xa0] sm:$0xff]  ;;  %v881_v48 = vld [vmem:[#allocation2 + $0x170] ss:$0 sm:$0xff] }
 0x513   : > { %v738_v50 = vadd.f32 %v736_v12, %v734_v46  ;;  %v1310_v51 = vpop.f32.mrb[10].mxu0  ;;  %v972_v46 = vld [vmem:[#allocation2 + $0xb0] sm:$0xff] }
 0x514   : > { %v741_v52 = vmul.f32 %v1310_v51, %v1816_v30  ;;  %v721_v53 = vpop.f32.mrb[11].mxu0  ;;  %v1398_v47 = vpack.c.bf16 %v972_v46, %v971_v45 }
 0x515   : > { %v740_v54 = vmul.f32 %v721_v53, %v1816_v30  ;;  %v973_v53 = vld [vmem:[#allocation2 + $0x157] ss:$0 sm:$0xff] }
 0x516   : > { %v743_v55 = vadd.f32 %v741_v52, %v739_v49 }
 0x517   : > { %v742_v17 = vadd.f32 %v740_v54, %v738_v50 }
 0x519   : > { %1319 = vmatprep.mubr.msk.f32.mxu1 %vm164_vm0, %v742_v17 }
 0x51a   : > { %1320 = vmatmul.mubr.msk.f32.vlgmr.msra.gmra.mrb[6].mxu1 %vm164_vm0, %v743_v55 }
 0x51b   : > { %1389 = vmatpush3.bf16.msra.mxu1 %v1386_v23 }
 0x51c   : > { %1391 = vmatprep.subr.bf16.mxu1 %v1390_v25 }
 0x51f   : > { %1393 = vmatpush3.bf16.msra.mxu1 %v1390_v25 }
 0x520   : > { %1395 = vmatprep.subr.bf16.mxu1 %v1394_v29 }
 0x523   : > { %1397 = vmatpush3.bf16.msra.mxu1 %v1394_v29 }
 0x524   : > { %1399 = vmatprep.subr.bf16.mxu1 %v1398_v47 }
 0x527   : > { %1401 = vmatpush3.bf16.msra.mxu1 %v1398_v47 }
 0x5ed   : > { %v1321_v56 = vpop.f32.mrb[6].mxu1 }
 0x5ee   : > { %v839_v57 = vadd.f32 %v1321_v56, %v744_v18  ;;  %v833_v58 = vpop.f32.mrb[7].mxu1 }
 0x5ef   : > { %v834_v59 = vadd.f32 %v833_v58, %v744_v18 }
 0x5f0   : > { %v843_v26 = vadd.f32 %v839_v57, %v1764_v9 }
 0x5f1   : > { %v842_v60 = vadd.f32 %v834_v59, %v1756_v6  ;;  %v877_v6 = vld [vmem:[#allocation2 + $0x8] sm:$0xff] }
 0x5f2   : > { %v847_v61 = vsel %vm164_vm0, %v843_v26, 0.0  ;;  %v1378_v10 = vpack.c.bf16 %v878_v8, %v877_v6 }
 0x5f3   : > { %848 = vadd.xlane.f32.xlu1 %v847_v61  ;;  %v844_v30 = vsel %vm164_vm0, %v842_v60, 0.0 }
 0x5f4   : > { %845 = vadd.xlane.f32.xlu0 %v844_v30  ;;  %1379 = vmatprep.subr.bf16.mxu0 %v1378_v10 }
 0x5f5   : > { %1381 = vmatpush3.bf16.msra.mxu0 %v1378_v10 }
 0x5f6   : > { %1383 = vmatprep.subr.bf16.mxu0 %v1382_v16 }
 0x5f9   : > { %1385 = vmatpush3.bf16.msra.mxu0 %v1382_v16  ;;  %v1087_v16 = vld [vmem:[#allocation2 + $0x161] ss:$0 sm:$0xff] }
 0x680   : > { %v849_v62 = vpop.xlane.xlu1 %848 }
 0x681   : > { %v852_v63 = vmul.f32 0.03125, %v849_v62  ;;  %v846_v4 = vpop.xlane.xlu0 %845 }
 0x682   : > { %v851_v0 = vmul.f32 0.03125, %v846_v4 }
 0x683   : > { %v854_v1 = vsub.f32 %v843_v26, %v852_v63 }
 0x684   : > { %v853_v2 = vsub.f32 %v842_v60, %v851_v0 }
 0x685   : > { %v856_v7 = vmul.f32 %v854_v1, %v854_v1 }
 0x686   : > { %v855_v3 = vmul.f32 %v853_v2, %v853_v2 }
 0x687   : > { %v860_v9 = vsel %vm164_vm0, %v856_v7, 0.0 }
 0x688   : > { %v857_v5 = vsel %vm164_vm0, %v855_v3, 0.0 }
 0x689   : > { %858 = vadd.xlane.f32.xlu0 %v857_v5 }
 0x68d   : > { %861 = vadd.xlane.f32.xlu0 %v860_v9 }
 0x716   : > { %v859_v31 = vpop.xlane.xlu0 %858 }
 0x717   : > { %v863_v13 = vmul.f32 0.03125, %v859_v31 }
 0x719   : > { %v865_v32 = vadd.f32 1e-05, %v863_v13 }
 0x71a   : > { %v862_v33 = vpop.xlane.xlu0 %861 }
 0x71b   : > { %1525 = vrsqrt.f32 %v865_v32  ;;  %v864_v34 = vmul.f32 0.03125, %v862_v33 }
 0x71d   : > { %v866_v35 = vadd.f32 1e-05, %v864_v34 }
 0x71f   : > { %1527 = vrsqrt.f32 %v866_v35 }
 0x725   : > { %v1526_v36 = vpop.eup %1525 }
 0x726   : > { %v869_v38 = vmul.f32 %v1526_v36, %v853_v2 }
 0x728   : > { %v872_v40 = vmul.f32 %v871_v37, %v869_v38 }
 0x729   : > { %v1528_v41 = vpop.eup %1527 }
 0x72a   : > { %v870_v42 = vmul.f32 %v1528_v41, %v854_v1  ;;  %v875_v19 = vadd.f32 %v874_v39, %v872_v40 }
 0x72c   : > { %v873_v43 = vmul.f32 %v871_v37, %v870_v42  ;;  %1330 = vmatprep.mubr.msk.f32.mxu0 %vm164_vm0, %v875_v19 }
 0x72e   : > { %v876_v44 = vadd.f32 %v874_v39, %v873_v43 }
 0x730   : > { %1331 = vmatmul.mubr.msk.f32.vlgmr.msra.gmra.mrb[12].mxu0 %vm164_vm0, %v876_v44 }
 0x803   : > { %v1332_v14 = vpop.f32.mrb[12].mxu0 }
 0x804   : > { %v960_v12 = vadd.f32 %v1332_v14, %v881_v48  ;;  %v954_v49 = vpop.f32.mrb[13].mxu0 }
 0x805   : > { %v955_v50 = vadd.f32 %v954_v49, %v881_v48 }
 0x806   : > { %v964_v52 = vmax.f32 %v960_v12, 0.0 }
 0x807   : > { %v963_v51 = vmax.f32 %v955_v50, 0.0 }
 0x809   : > { %1349 = vmatprep.mubr.msk.f32.mxu1 %vm974_vm6, %v963_v51 }
 0x80a   : > { %1350 = vmatmul.mubr.msk.f32.vlgmr.msra.gmra.mrb[8].mxu1 %vm974_vm6, %v964_v52 }
 0x8dd   : > { %v1351_v54 = vpop.f32.mrb[8].mxu1 }
 0x8de   : > { %v1047_v55 = vpop.f32.mrb[9].mxu1  ;;  %v1053_v17 = vadd.f32 %v1351_v54, %v973_v53 }
 0x8df   : > { %v1048_v18 = vadd.f32 %v1047_v55, %v973_v53 }
 0x8e0   : > { %v1057_v58 = vadd.f32 %v1053_v17, %v876_v44 }
 0x8e1   : > { %v1056_v56 = vadd.f32 %v1048_v18, %v875_v19 }
 0x8e2   : > { %v1061_v59 = vsel %vm164_vm0, %v1057_v58, 0.0 }
 0x8e3   : > { %v1058_v57 = vsel %vm164_vm0, %v1056_v56, 0.0 }
 0x8e4   : > { %1059 = vadd.xlane.f32.xlu0 %v1058_v57 }
 0x8e8   : > { %1062 = vadd.xlane.f32.xlu0 %v1061_v59 }
 0x971   : > { %v1060_v26 = vpop.xlane.xlu0 %1059 }
 0x972   : > { %v1064_v60 = vmul.f32 0.03125, %v1060_v26 }
 0x974   : > { %v1066_v61 = vsub.f32 %v1056_v56, %v1064_v60 }
 0x975   : > { %v1063_v30 = vpop.xlane.xlu0 %1062 }
 0x976   : > { %v1065_v62 = vmul.f32 0.03125, %v1063_v30  ;;  %v1068_v63 = vmul.f32 %v1066_v61, %v1066_v61 }
 0x978   : > { %v1067_v4 = vsub.f32 %v1057_v58, %v1065_v62  ;;  %v1070_v0 = vsel %vm164_vm0, %v1068_v63, 0.0 }
 0x979   : > { %1071 = vadd.xlane.f32.xlu0 %v1070_v0 }
 0x97a   : > { %v1069_v1 = vmul.f32 %v1067_v4, %v1067_v4 }
 0x97c   : > { %v1073_v2 = vsel %vm164_vm0, %v1069_v1, 0.0 }
 0x97d   : > { %1074 = vadd.xlane.f32.xlu0 %v1073_v2 }
 0xa06   : > { %v1072_v3 = vpop.xlane.xlu0 %1071 }
 0xa07   : > { %v1076_v5 = vmul.f32 0.03125, %v1072_v3 }
 0xa09   : > { %v1078_v7 = vadd.f32 1e-05, %v1076_v5 }
 0xa0a   : > { %v1075_v9 = vpop.xlane.xlu0 %1074 }
 0xa0b   : > { %1529 = vrsqrt.f32 %v1078_v7  ;;  %v1077_v6 = vmul.f32 0.03125, %v1075_v9 }
 0xa0d   : > { %v1079_v8 = vadd.f32 1e-05, %v1077_v6 }
 0xa0f   : > { %1531 = vrsqrt.f32 %v1079_v8 }
 0xa15   : > { %v1530_v10 = vpop.eup %1529 }
 0xa16   : > { %v1082_v15 = vmul.f32 %v1530_v10, %v1066_v61 }
 0xa18   : > { %v1085_v20 = vmul.f32 %v1084_v11, %v1082_v15 }
 0xa19   : > { %v1532_v21 = vpop.eup %1531 }
 0xa1a   : > { %v1088_v22 = vadd.f32 %v1087_v16, %v1085_v20  ;;  %v1083_v23 = vmul.f32 %v1532_v21, %v1067_v4 }
 0xa1c   : > { %v1086_v24 = vmul.f32 %v1084_v11, %v1083_v23  ;;  %1090 = vst.msk [vmem:[%s151_s29] sm:$0xff] %vm164_vm0, %v1088_v22 }
 0xa1e   : > { %v1089_v25 = vadd.f32 %v1087_v16, %v1086_v24 }
 0xa20   : > { %1091 = vst.msk [vmem:[%s151_s29 + $0x8] sm:$0xff] %vm164_vm0, %v1089_v25 }
 0xa21   : > { %1574 = shalt.err (!%p1571_p7)
}
 0xa22   : > { %s1575_s16 = scalar_lea.hbm %s1896_s5, 256  ;;  %s1579_s24 = scalar_lea.hbm %s1944_s2, 2048 }
 0xa23   : > { %p1576_p8 = scmp.ne.s32.totalorder %s1896_s5, %s1575_s16  ;;  %p1580_p1 = scmp.lt.u32.totalorder %s1896_s5, %s1944_s2 }
 0xa24   : > { %p1581_p0 = scmp.lt.u32.totalorder %s1579_s24, %s1575_s16  ;;  %p1583_p6 = scmp.lt.u32.totalorder %s1575_s16, %s1896_s5 }
 0xa25   : > { %p1577_p11 = pnand %p1576_p8, %p1955_p9 }
 0xa26   : > { %p1582_p5 = por %p1581_p0, %p1580_p1 }
 0xa27   : > { %p1578_p13 = pneg %p1577_p11 }
 0xa28   : > { %p1584_p10 = por %p1583_p6, %p1582_p5 }
 0xa2a   : > { %p1585_p12 = pnand %p1584_p10, %p1578_p13 }
 0xa2c   : > { %1588 = shalt.err (!%p1585_p12)
}
 0xa2d   : > { %s1636_s25 = smov 128   ;;  %s1637_s26 = smov 8  }
 0xa2e   : > { %1409 = dma.vmem_to_hbm [thread:$0]  (%p1955_p9), %s1898_s30, 256, %s1896_s5, %s1901_s6, %s1636_s25, %s1636_s25, %s1637_s26  }
 0xa2f PF: > { %p1421_p2 = scmp.ge.s32.totalorder %s1627_s12, 2  ;;  %s1121_s27 = sand.u32 1, %s1615_s9  }
 0xa30   : > { %p1956_p3 = scmp.ne.s32.totalorder %s1949_s20, 0  ;;  %s1122_s28 = scalar_lea.sflag [#allocation4], %s1121_s27 }
 0xa32   : > { %p1416_p4 = pnand %p1421_p2, %p1956_p3 }
 0xa34   : > { %1610 = dma.done.wait (!%p1416_p4), %s1122_s28, 256  }
 0xa35   : > { %1612 = vsyncadd (!%p1416_p4), %s1122_s28, 4294967040  ;;  %p13_p7 = scmp.ge.s32.totalorder %s1678_s15, 10   ;;  %s1957_s9 = smov %s1619_s10 }
 0xa36   : > { %s1958_s10 = smov %s1623_s11  ;;  %s1959_s11 = smov %s1689_s18 }
 0xa37   : > { %s1960_s12 = smov %s1678_s15  ;;  %15 = sbr.rel (!%p13_p7) target bundleno = 4 (0x4), region = 68 }
 0xa3e   :  { %1127 = vsyncpa [#allocation3], 1 }
 0xa3f   :  { %1129 = vsyncpa [#allocation3 + $0x1], 1 }
 0xa40   :  { %1130 = vsyncpa [#allocation4], 1 }
 0xa41   :  { %1132 = vsyncpa [#allocation4 + $0x1], 1 }

</bundles_post_ra>
